<compile_context>
chip_gen: v6e
topology: v6e:2x2x1
jax: 0.10.0
libtpu: 0.0.40
codegen_flags: <defaults>
</compile_context>

<pallas_src>
import functools

import jax
import jax.numpy as jnp
from jax.experimental import pallas as pl
from jax.experimental.pallas import tpu as pltpu


def self_attention_v2_kernel(x_ref, w_qkv_ref, out_ref, *, seq_len, s_pad, d_out_pad):
    x = x_ref[...]                       # (S_pad, d_in_pad)   compute_dtype
    w = w_qkv_ref[...]                   # (d_in_pad, 3*d_out_pad) compute_dtype
    mxu_dtype = x.dtype                  # bf16 on v6e/v7x, f32 on v5e / demo

    # Fused Q/K/V projection: one wide MXU push, f32 accumulation, then static
    # 128-lane-aligned slices. Scale is already folded into the query columns.
    qkv = jnp.dot(x, w, preferred_element_type=jnp.float32)     # (S_pad, 3*d_out_pad)
    q = qkv[:, :d_out_pad].astype(mxu_dtype)
    k = qkv[:, d_out_pad:2 * d_out_pad].astype(mxu_dtype)
    v = qkv[:, 2 * d_out_pad:].astype(mxu_dtype)

    # scores = q @ k^T without materializing a transpose: contract last axes.
    scores = jax.lax.dot_general(
        q, k,
        dimension_numbers=(((1,), (1,)), ((), ())),
        preferred_element_type=jnp.float32,
    )                                    # (S_pad, S_pad) f32

    # Mask padded key columns only when padding actually exists (static guard);
    # (1, S_pad) iota broadcasts against the scores instead of a full 2-D iota.
    if seq_len < s_pad:
        key_idx = jax.lax.broadcasted_iota(jnp.int32, (1, s_pad), 1)
        scores = jnp.where(key_idx < seq_len, scores, jnp.float32(-1e30))

    # Row-wise softmax in f32 (max-subtracted); exact reciprocal on the EUP.
    m = jnp.max(scores, axis=-1, keepdims=True)
    e = jnp.exp(scores - m)
    denom = jnp.sum(e, axis=-1, keepdims=True)
    attn = e * pl.reciprocal(denom, approx=False)               # (S_pad, S_pad) f32

    # context = attn @ V, MXU operands in compute dtype, f32 accumulation,
    # lane-dense (S_pad, 128) unmasked store.
    out_ref[...] = jnp.dot(
        attn.astype(mxu_dtype), v, preferred_element_type=jnp.float32
    ).astype(out_ref.dtype)


def _round_up(n, m):
    return ((n + m - 1) // m) * m


@functools.partial(jax.jit, static_argnames=("compute_dtype",))
def self_attention_v2(x, w_query, w_key, w_value, compute_dtype=jnp.float32):
    """x: (S, d_in) f32.  w_*: PyTorch nn.Linear layout (d_out, d_in) f32."""
    S, d_in = x.shape
    d_out = w_query.shape[0]

    # Hardware-granularity padding: sublane multiple of 8, lane multiple of 128.
    s_pad = _round_up(S, 8)
    d_in_pad = _round_up(d_in, 128)
    d_out_pad = _round_up(d_out, 128)

    # PyTorch forward divides scores by keys.shape[-1] ** 0.5 == sqrt(d_out);
    # fold it into the query weight columns so the kernel never multiplies.
    scale = 1.0 / float(d_out) ** 0.5

    def pad_weight(w, col_scale=1.0):
        # (d_out, d_in) -> transpose, scale, zero-pad to (d_in_pad, d_out_pad).
        wt = w.astype(jnp.float32).T * jnp.float32(col_scale)
        return jnp.zeros((d_in_pad, d_out_pad), jnp.float32).at[:d_in, :d_out].set(wt)

    # Fused, pre-transposed, padded QKV weight: (d_in_pad, 3*d_out_pad).
    w_qkv = jnp.concatenate(
        [pad_weight(w_query, scale), pad_weight(w_key), pad_weight(w_value)], axis=1
    ).astype(compute_dtype)
    x_pad = (
        jnp.zeros((s_pad, d_in_pad), jnp.float32)
        .at[:S, :d_in].set(x.astype(jnp.float32))
        .astype(compute_dtype)
    )

    kernel = functools.partial(
        self_attention_v2_kernel, seq_len=S, s_pad=s_pad, d_out_pad=d_out_pad
    )

    out_pad = pl.pallas_call(
        kernel,
        out_shape=jax.ShapeDtypeStruct((s_pad, d_out_pad), jnp.float32),
        in_specs=[
            pl.BlockSpec(memory_space=pltpu.MemorySpace.VMEM),
            pl.BlockSpec(memory_space=pltpu.MemorySpace.VMEM),
        ],
        out_specs=pl.BlockSpec(memory_space=pltpu.MemorySpace.VMEM),
    )(x_pad, w_qkv)

    # Drop padded rows / lanes (fuses into the jitted computation).
    return out_pad[:S, :d_out]


def _reference(x, w_query, w_key, w_value):
    q = x @ w_query.T
    k = x @ w_key.T
    v = x @ w_value.T
    scores = q @ k.T / jnp.sqrt(jnp.float32(k.shape[-1]))
    w = jax.nn.softmax(scores, axis=-1)
    return w @ v


if __name__ == "__main__":
    d_in, d_out = 3, 2

    # Input tokens from the script (6 tokens, d_in=3).
    x = jnp.array(
        [[0.43, 0.15, 0.89],
         [0.55, 0.87, 0.66],
         [0.57, 0.85, 0.64],
         [0.22, 0.58, 0.33],
         [0.77, 0.25, 0.10],
         [0.05, 0.80, 0.55]],
        dtype=jnp.float32,
    )

    # Deterministic params mimicking nn.Linear: U(-1/sqrt(d_in), 1/sqrt(d_in)),
    # weight shape (d_out, d_in), no bias (qkv_bias=False).
    key = jax.random.PRNGKey(0)
    kq, kk, kv = jax.random.split(key, 3)
    bound = 1.0 / jnp.sqrt(jnp.float32(d_in))
    w_query = jax.random.uniform(kq, (d_out, d_in), jnp.float32, -bound, bound)
    w_key = jax.random.uniform(kk, (d_out, d_in), jnp.float32, -bound, bound)
    w_value = jax.random.uniform(kv, (d_out, d_in), jnp.float32, -bound, bound)

    ref = _reference(x, w_query, w_key, w_value)

    # f32 path (v5e-style / tight numerics): exact reciprocal, all-f32 math.
    out_f32 = jax.block_until_ready(
        self_attention_v2(x, w_query, w_key, w_value, compute_dtype=jnp.float32)
    )
    assert out_f32.shape == (x.shape[0], d_out), out_f32.shape
    assert jnp.allclose(out_f32, ref, atol=1e-5, rtol=1e-5), (out_f32, ref)

    # bf16 MXU-operand path (v6e/v7x): f32 accumulation + f32 softmax math.
    out_bf16 = jax.block_until_ready(
        self_attention_v2(x, w_query, w_key, w_value, compute_dtype=jnp.bfloat16)
    )
    assert out_bf16.shape == (x.shape[0], d_out), out_bf16.shape
    assert jnp.allclose(out_bf16, ref, atol=2e-2, rtol=2e-2), (out_bf16, ref)

    print("KERNEL_OK")
</pallas_src>

<mosaic_0001>
module attributes {stable_mosaic.version = 11 : i64} {
  func.func @self_attention_v2_kernel(%arg0: memref<8x128xf32, #tpu.memory_space<vmem>>, %arg1: memref<128x384xf32, #tpu.memory_space<vmem>>, %arg2: memref<8x128xf32, #tpu.memory_space<vmem>>) attributes {dimension_semantics = [], scalar_prefetch = 0 : i64, scratch_operands = 0 : i64, tpu.core_type = #tpu.core_type<tc>} {
    %c0 = arith.constant 0 : index
    %c0_0 = arith.constant 0 : index
    %0 = vector.load %arg0[%c0, %c0_0] : memref<8x128xf32, #tpu.memory_space<vmem>>, vector<8x128xf32>
    %c0_1 = arith.constant 0 : index
    %c0_2 = arith.constant 0 : index
    %1 = vector.load %arg1[%c0_1, %c0_2] : memref<128x384xf32, #tpu.memory_space<vmem>>, vector<128x384xf32>
    %cst = arith.constant dense<0.000000e+00> : vector<8x384xf32>
    %2 = tpu.matmul %0, %1, %cst {dimension_numbers = #tpu.dot_dimension_numbers<[1], [0], [0], [1], [0, 0, 1, 1], [], []>} : vector<8x128xf32>, vector<128x384xf32>, vector<8x384xf32> -> vector<8x384xf32>
    %3 = vector.extract_strided_slice %2 {offsets = [0, 0], sizes = [8, 128], strides = [1, 1]} : vector<8x384xf32> to vector<8x128xf32>
    %4 = vector.extract_strided_slice %2 {offsets = [0, 128], sizes = [8, 128], strides = [1, 1]} : vector<8x384xf32> to vector<8x128xf32>
    %5 = vector.extract_strided_slice %2 {offsets = [0, 256], sizes = [8, 128], strides = [1, 1]} : vector<8x384xf32> to vector<8x128xf32>
    %cst_3 = arith.constant dense<0.000000e+00> : vector<8x8xf32>
    %6 = tpu.matmul %3, %4, %cst_3 {dimension_numbers = #tpu.dot_dimension_numbers<[1], [1], [0], [0], [0, 0, 1, 0], [], []>} : vector<8x128xf32>, vector<8x128xf32>, vector<8x8xf32> -> vector<8x8xf32>
    %7 = tpu.iota {dimensions = array<i32: 1>} : vector<1x8xi32>
    %c6_i32 = arith.constant 6 : i32
    %8 = vector.broadcast %c6_i32 : i32 to vector<1x8xi32>
    %9 = arith.cmpi slt, %7, %8 : vector<1x8xi32>
    %cst_4 = arith.constant -1.000000e+30 : f32
    %10 = vector.shape_cast %9 : vector<1x8xi1> to vector<1x8xi1>
    %11 = vector.broadcast %10 : vector<1x8xi1> to vector<8x8xi1>
    %12 = vector.broadcast %cst_4 : f32 to vector<8x8xf32>
    %13 = arith.select %11, %6, %12 : vector<8x8xi1>, vector<8x8xf32>
    %cst_5 = arith.constant dense<0xFF800000> : vector<8xf32>
    %14 = vector.multi_reduction <maximumf>, %13, %cst_5 [1] : vector<8x8xf32> to vector<8xf32>
    %15 = vector.shape_cast %14 : vector<8xf32> to vector<8x1xf32>
    %16 = vector.broadcast %15 : vector<8x1xf32> to vector<8x8xf32>
    %17 = arith.subf %13, %16 : vector<8x8xf32>
    %18 = math.exp %17 : vector<8x8xf32>
    %cst_6 = arith.constant dense<0.000000e+00> : vector<8xf32>
    %19 = vector.multi_reduction <add>, %18, %cst_6 [1] : vector<8x8xf32> to vector<8xf32>
    %20 = vector.shape_cast %19 : vector<8xf32> to vector<8x1xf32>
    %21 = tpu.reciprocal %20 : vector<8x1xf32> -> vector<8x1xf32>
    %22 = vector.broadcast %21 : vector<8x1xf32> to vector<8x8xf32>
    %23 = arith.mulf %18, %22 : vector<8x8xf32>
    %cst_7 = arith.constant dense<0.000000e+00> : vector<8x128xf32>
    %24 = tpu.matmul %23, %5, %cst_7 {dimension_numbers = #tpu.dot_dimension_numbers<[1], [0], [0], [1], [0, 0, 1, 1], [], []>} : vector<8x8xf32>, vector<8x128xf32>, vector<8x128xf32> -> vector<8x128xf32>
    %c0_8 = arith.constant 0 : index
    %c0_9 = arith.constant 0 : index
    %25 = vector.load %arg2[%c0_8, %c0_9] : memref<8x128xf32, #tpu.memory_space<vmem>>, vector<8x128xf32>
    tpu.vector_store %arg2[%c0_8, %c0_9], %24 {strides = array<i32>} : memref<8x128xf32, #tpu.memory_space<vmem>>, vector<8x128xf32>,
    return
  }
}

</mosaic_0001>

<bundles_post_ra>
// kernel: self_attention_v2.1
= control target key start
LH: loop header
LB: loop body
LE: loop exit
PB: predicated region body
PF: predicated region fallthrough
CT: control target
= control target key end

     0   :  { %v440_v3 = vmov 0.0   ;;  %vm441_vm0 = vmmov 0   ;;  %v271_v52 = vlaneseq  ;;  %vm277_vm2 = vcmask 64512   ;;  %s635_s1 = inlined_call_operand.vmem [shape: f32[128,384], index: 1, kind: input, shape index: {}]   ;;  %s636_s0 = inlined_call_operand.vmem [shape: f32[8,128], index: 0, kind: input, shape index: {}]   ;;  %s637_s2 = inlined_call_operand.vmem [shape: f32[8,128], index: 2, kind: output, shape index: {}]  }
   0x1   :  { %v58_v0 = vld [vmem:[%s635_s1 + $0x170] sm:$0xff]  ;;  %v57_v1 = vld [vmem:[%s635_s1 + $0x168] sm:$0xff]  ;;  %v55_v2 = vld [vmem:[%s635_s1 + $0x158] sm:$0xff]  ;;  %124 = vmatprep.mubr.f32.mxu0 %v440_v3  ;;  %389 = vmatprep.subr.mxu1 %v440_v3 }
   0x2   :  { %60 = vmatprep.subr.mxu0 %v58_v0  ;;  %v54_v4 = vld [vmem:[%s635_s1 + $0x150] sm:$0xff]  ;;  %v52_v5 = vld [vmem:[%s635_s1 + $0x140] sm:$0xff]  ;;  %v51_v6 = vld [vmem:[%s635_s1 + $0x138] sm:$0xff]  ;;  %421 = vmatprep.mubr.msk.f32.mxu1 %vm441_vm0, %v440_v3  ;;  %v272_v53 = vand.u32 127, %v271_v52 }
   0x3   :  { %61 = vmatpush1.msra.mxu0 %v57_v1  ;;  %v49_v7 = vld [vmem:[%s635_s1 + $0x128] sm:$0xff]  ;;  %v48_v8 = vld [vmem:[%s635_s1 + $0x120] sm:$0xff]  ;;  %v46_v9 = vld [vmem:[%s635_s1 + $0x110] sm:$0xff] }
   0x4   :  { %62 = vmatprep.subr.mxu0 %v55_v2  ;;  %v45_v10 = vld [vmem:[%s635_s1 + $0x108] sm:$0xff]  ;;  %v43_v11 = vld [vmem:[%s635_s1 + $0xf8] sm:$0xff]  ;;  %v42_v12 = vld [vmem:[%s635_s1 + $0xf0] sm:$0xff]  ;;  %vm273_vm1 = vcmp.lt.s32.totalorder %v272_v53, 6 }
   0x5   :  { %63 = vmatpush1.msra.mxu0 %v54_v4  ;;  %v40_v13 = vld [vmem:[%s635_s1 + $0xe0] sm:$0xff]  ;;  %v39_v14 = vld [vmem:[%s635_s1 + $0xd8] sm:$0xff]  ;;  %v37_v15 = vld [vmem:[%s635_s1 + $0xc8] sm:$0xff] }
   0x6   :  { %64 = vmatprep.subr.mxu0 %v52_v5  ;;  %v36_v16 = vld [vmem:[%s635_s1 + $0xc0] sm:$0xff]  ;;  %v34_v17 = vld [vmem:[%s635_s1 + $0xb0] sm:$0xff]  ;;  %v33_v18 = vld [vmem:[%s635_s1 + $0xa8] sm:$0xff] }
   0x7   :  { %65 = vmatpush1.msra.mxu0 %v51_v6  ;;  %v31_v19 = vld [vmem:[%s635_s1 + $0x98] sm:$0xff]  ;;  %v30_v20 = vld [vmem:[%s635_s1 + $0x90] sm:$0xff]  ;;  %v28_v21 = vld [vmem:[%s635_s1 + $0x80] sm:$0xff] }
   0x8   :  { %66 = vmatprep.subr.mxu0 %v49_v7  ;;  %v27_v22 = vld [vmem:[%s635_s1 + $0x78] sm:$0xff]  ;;  %v25_v23 = vld [vmem:[%s635_s1 + $0x68] sm:$0xff]  ;;  %v24_v24 = vld [vmem:[%s635_s1 + $0x60] sm:$0xff] }
   0x9   :  { %67 = vmatpush1.msra.mxu0 %v48_v8  ;;  %v22_v25 = vld [vmem:[%s635_s1 + $0x50] sm:$0xff]  ;;  %v21_v26 = vld [vmem:[%s635_s1 + $0x48] sm:$0xff]  ;;  %v19_v27 = vld [vmem:[%s635_s1 + $0x38] sm:$0xff] }
   0xa   :  { %68 = vmatprep.subr.mxu0 %v46_v9  ;;  %v18_v28 = vld [vmem:[%s635_s1 + $0x30] sm:$0xff]  ;;  %v16_v29 = vld [vmem:[%s635_s1 + $0x20] sm:$0xff]  ;;  %v15_v30 = vld [vmem:[%s635_s1 + $0x18] sm:$0xff] }
   0xb   :  { %69 = vmatpush1.msra.mxu0 %v45_v10  ;;  %v13_v31 = vld [vmem:[%s635_s1 + $0x8] sm:$0xff]  ;;  %v12_v32 = vld [vmem:[%s635_s1] sm:$0xff]  ;;  %v59_v36 = vld [vmem:[%s635_s1 + $0x178] sm:$0xff] }
   0xc   :  { %70 = vmatprep.subr.mxu0 %v43_v11  ;;  %v11_v33 = vld [vmem:[%s636_s0] sm:$0xff]  ;;  %390 = vmatpush3.msra.mxu1 %v59_v36  ;;  %v53_v38 = vld [vmem:[%s635_s1 + $0x148] sm:$0xff]  ;;  %v50_v39 = vld [vmem:[%s635_s1 + $0x130] sm:$0xff] }
   0xd   :  { %71 = vmatpush1.msra.mxu0 %v42_v12  ;;  %v56_v37 = vld [vmem:[%s635_s1 + $0x160] sm:$0xff]  ;;  %391 = vmatprep.subr.mxu1 %v440_v3  ;;  %v47_v40 = vld [vmem:[%s635_s1 + $0x118] sm:$0xff]  ;;  %v41_v42 = vld [vmem:[%s635_s1 + $0xe8] sm:$0xff] }
   0xe   :  { %72 = vmatprep.subr.mxu0 %v40_v13  ;;  %392 = vmatpush3.msra.mxu1 %v56_v37  ;;  %v44_v41 = vld [vmem:[%s635_s1 + $0x100] sm:$0xff]  ;;  %v38_v43 = vld [vmem:[%s635_s1 + $0xd0] sm:$0xff]  ;;  %v35_v44 = vld [vmem:[%s635_s1 + $0xb8] sm:$0xff] }
   0xf   :  { %73 = vmatpush1.msra.mxu0 %v39_v14  ;;  %393 = vmatprep.subr.mxu1 %v440_v3  ;;  %v32_v45 = vld [vmem:[%s635_s1 + $0xa0] sm:$0xff]  ;;  %v29_v46 = vld [vmem:[%s635_s1 + $0x88] sm:$0xff]  ;;  %v26_v47 = vld [vmem:[%s635_s1 + $0x70] sm:$0xff] }
  0x10   :  { %74 = vmatprep.subr.mxu0 %v37_v15  ;;  %394 = vmatpush3.msra.mxu1 %v53_v38  ;;  %v23_v48 = vld [vmem:[%s635_s1 + $0x58] sm:$0xff]  ;;  %v20_v49 = vld [vmem:[%s635_s1 + $0x40] sm:$0xff]  ;;  %v17_v50 = vld [vmem:[%s635_s1 + $0x28] sm:$0xff] }
  0x11   :  { %75 = vmatpush1.msra.mxu0 %v36_v16  ;;  %395 = vmatprep.subr.mxu1 %v440_v3  ;;  %v14_v51 = vld [vmem:[%s635_s1 + $0x10] sm:$0xff] }
  0x12   :  { %76 = vmatprep.subr.mxu0 %v34_v17  ;;  %396 = vmatpush3.msra.mxu1 %v50_v39 }
  0x13   :  { %77 = vmatpush1.msra.mxu0 %v33_v18  ;;  %397 = vmatprep.subr.mxu1 %v440_v3 }
  0x14   :  { %78 = vmatprep.subr.mxu0 %v31_v19  ;;  %398 = vmatpush3.msra.mxu1 %v47_v40 }
  0x15   :  { %79 = vmatpush1.msra.mxu0 %v30_v20  ;;  %399 = vmatprep.subr.mxu1 %v440_v3 }
  0x16   :  { %80 = vmatprep.subr.mxu0 %v28_v21  ;;  %400 = vmatpush3.msra.mxu1 %v44_v41 }
  0x17   :  { %81 = vmatpush1.msra.mxu0 %v27_v22  ;;  %401 = vmatprep.subr.mxu1 %v440_v3 }
  0x18   :  { %82 = vmatprep.subr.mxu0 %v25_v23  ;;  %402 = vmatpush3.msra.mxu1 %v41_v42 }
  0x19   :  { %83 = vmatpush1.msra.mxu0 %v24_v24  ;;  %403 = vmatprep.subr.mxu1 %v440_v3 }
  0x1a   :  { %84 = vmatprep.subr.mxu0 %v22_v25  ;;  %404 = vmatpush3.msra.mxu1 %v38_v43 }
  0x1b   :  { %85 = vmatpush1.msra.mxu0 %v21_v26  ;;  %405 = vmatprep.subr.mxu1 %v440_v3 }
  0x1c   :  { %86 = vmatprep.subr.mxu0 %v19_v27  ;;  %406 = vmatpush3.msra.mxu1 %v35_v44 }
  0x1d   :  { %87 = vmatpush1.msra.mxu0 %v18_v28  ;;  %407 = vmatprep.subr.mxu1 %v440_v3 }
  0x1e   :  { %88 = vmatprep.subr.mxu0 %v16_v29  ;;  %408 = vmatpush3.msra.mxu1 %v32_v45 }
  0x1f   :  { %89 = vmatpush1.msra.mxu0 %v15_v30  ;;  %409 = vmatprep.subr.mxu1 %v440_v3 }
  0x20   :  { %90 = vmatprep.subr.mxu0 %v13_v31  ;;  %410 = vmatpush3.msra.mxu1 %v29_v46 }
  0x21   :  { %91 = vmatpush1.msra.mxu0 %v12_v32  ;;  %411 = vmatprep.subr.mxu1 %v440_v3 }
  0x22   :  { %125 = vmatmul.mubr.f32.vlgmr.msra.gmra.mxu0 %v11_v33  ;;  %424 = vmatprep.subr.mxu0 %v440_v3 }
  0x23   :  { %426 = vmatprep.mubr.msk.f32.mxu0 %vm441_vm0, %v440_v3  ;;  %412 = vmatpush3.msra.mxu1 %v26_v47 }
  0x24   :  { %413 = vmatprep.subr.mxu1 %v440_v3 }
  0x25   :  { %414 = vmatpush3.msra.mxu1 %v23_v48 }
  0x26   :  { %415 = vmatprep.subr.mxu1 %v440_v3 }
  0x27   :  { %416 = vmatpush3.msra.mxu1 %v20_v49 }
  0x28   :  { %417 = vmatprep.subr.mxu1 %v440_v3 }
  0x29   :  { %418 = vmatpush3.msra.mxu1 %v17_v50 }
  0x2a   :  { %419 = vmatprep.subr.mxu1 %v440_v3 }
  0x2b   :  { %420 = vmatpush3.msra.mxu1 %v14_v51 }
  0x2c   :  { %422 = vmatmul.mubr.f32.vlgmr.msra.gmra.mxu1 %v11_v33  ;;  %429 = vmatprep.subr.mxu1 %v440_v3 }
  0x2d   :  { %431 = vmatprep.mubr.msk.f32.mxu1 %vm441_vm0, %v440_v3 }
  0xe2   :  { %v126_v34 = vpop.f32.mrf.mxu0 }
  0xe4   :  { %v128_v35 = vpop.f32.mrf.mxu0 }
  0xe5   :  { %425 = vmatpush3.xpose.msra.mxu0 %v128_v35 }
  0xe8   :  { %427 = vmatmul.mubr.f32.vlgmr.msra.gmra.mxu0 %v126_v34 }
  0xec   :  { %v197_v63 = vpop.f32.mrf.mxu1 }
  0xed   :  { %430 = vmatpush3.msra.mxu1 %v197_v63 }
  0xee   :  { %v423_v0 = vpop.f32.mrf.mxu1 }
 0x1a8   :  { %v267_v54 = vpop.f32.mrf.mxu0 }
 0x1a9   :  { %v276_v55 = vsel %vm273_vm1, %v267_v54, -1e+30 }
 0x1aa   :  { %v428_v56 = vpop.f32.mrf.mxu0  ;;  %v278_v57 = vsel %vm277_vm2, %v276_v55, -inf }
 0x1ab   :  { %279 = vmax.xlane.f32.xlu0 %v278_v57 }
 0x234   :  { %v280_v58 = vpop.xlane.xlu0 %279 }
 0x235   :  { %v281_v59 = vsub.f32 %v276_v55, %v280_v58 }
 0x237   :  { %v282_v60 = vmul.f32 1.442695, %v281_v59 }
 0x239   :  { %436 = vpow2.f32 %v282_v60 }
 0x246   :  { %v437_v61 = vpop.eup %436 }
 0x247   :  { %v284_v62 = vsel %vm277_vm2, %v437_v61, 0.0 }
 0x248   :  { %285 = vadd.xlane.f32.xlu0 %v284_v62 }
 0x2d1   :  { %v286_v1 = vpop.xlane.xlu0 %285 }
 0x2d2   :  { %438 = vrcp.f32 %v286_v1 }
 0x2df   :  { %v439_v2 = vpop.eup %438 }
 0x2e0   :  { %v288_v3 = vmul.f32 %v439_v2, %v437_v61 }
 0x2e2   :  { %432 = vmatmul.mubr.msk.f32.vlgmr.msra.gmra.mxu1 %vm277_vm2, %v288_v3 }
 0x3a2   :  { %v358_v4 = vpop.f32.mrf.mxu1 }
 0x3a3   :  { %362 = vst [vmem:[%s637_s2] sm:$0xff] %v358_v4 }
 0x3a4   :  { %v433_v5 = vpop.f32.mrf.mxu1 }

</bundles_post_ra>
